<compile_context>
chip_gen: v7x
topology: tpu7x:2x2x1
jax: 0.10.0
libtpu: 0.0.40
codegen_flags: <defaults>
</compile_context>

<pallas_src>
import functools

import jax
import jax.numpy as jnp
from jax.experimental import pallas as pl
from jax.experimental.pallas import tpu as pltpu

BN_EPS = 1e-5
LANE = 128


def _round_up(x, m):
    return (x + m - 1) // m * m


def _pad2(a, rows, cols):
    return jnp.pad(a, ((0, rows - a.shape[0]), (0, cols - a.shape[1])))


# ---------------------------------------------------------------------------
# Per-layer kernel:  z = D^-1/2 (A_hat @ g) @ W + b   with  g = D^-1/2 h_prev
# ---------------------------------------------------------------------------
def _make_layer_kernel(is_last, return_embeds, num_classes):
    def kernel(a_ref, g_ref, w_ref, b_ref, dr_ref, o_ref):
        # a_ref:  (TM, N_pad)      bf16, exact 0/1 row slab of A + I
        # g_ref:  (N_pad, Fin_pad) bf16, previous activations pre-scaled by D^-1/2
        # w_ref:  (Fin_pad, Fout_pad) bf16 (BN folded), b_ref: (1, Fout_pad) f32
        # dr_ref: (TM, 1) f32  = d^-1/2 for this row slab
        acc = jnp.dot(a_ref[...], g_ref[...], preferred_element_type=jnp.float32)
        # single f32 -> bf16 cast before the tiny weight matmul
        z = jnp.dot(acc.astype(jnp.bfloat16), w_ref[...],
                    preferred_element_type=jnp.float32)
        # post-scale rows by D^-1/2 in f32, then add the (BN-folded) bias
        z = z * dr_ref[...] + b_ref[...]
        if not is_last:
            # BatchNorm folded into (W, b); dropout identity in eval mode.
            # Pre-scale by D^-1/2 so the next layer can consume g directly.
            o_ref[...] = (jnp.maximum(z, 0.0) * dr_ref[...]).astype(o_ref.dtype)
        elif return_embeds:
            o_ref[...] = z
        else:
            # mask padded class lanes, then numerically-stable log-softmax
            col = jax.lax.broadcasted_iota(jnp.int32, z.shape, 1)
            z = jnp.where(col < num_classes, z, -jnp.inf)
            m = jnp.max(z, axis=-1, keepdims=True)
            zz = z - m
            lse = jnp.log(jnp.sum(jnp.exp(zz), axis=-1, keepdims=True))
            o_ref[...] = zz - lse

    return kernel


# ---------------------------------------------------------------------------
# Tile / VMEM budgeting (conservative enough for v7x's 64 MiB physical VMEM)
# ---------------------------------------------------------------------------
def _vmem_need_bytes(tm, n_pad, f_pad_max):
    a_bytes = 2 * tm * n_pad * 2                 # double-buffered bf16 A row slab
    g_bytes = 2 * n_pad * f_pad_max * 2          # resident activations (conservative x2)
    w_bytes = 2 * f_pad_max * f_pad_max * 2
    o_bytes = 2 * tm * f_pad_max * 4
    return a_bytes + g_bytes + w_bytes + o_bytes


def _pick_row_tile(n_pad, f_pad_max):
    budget = 40 * 1024 * 1024
    for tm in (512, 256, 128):
        if n_pad % tm:
            continue
        if _vmem_need_bytes(tm, n_pad, f_pad_max) <= budget:
            return tm
    return 128


def _vmem_limit_bytes(tm, n_pad, f_pad_max):
    need = _vmem_need_bytes(tm, n_pad, f_pad_max) + (1 << 20)
    if need <= 16 * 1024 * 1024:      # fits even v5e's default scoped limit
        return None
    return min(_round_up(need, 1 << 20) + (8 << 20), 48 * 1024 * 1024)


def _layer_pallas_call(kernel, a_hat, g, w, b, d_row, out_dtype, tm, vmem_limit):
    n_pad = a_hat.shape[0]
    f_in = g.shape[1]
    f_out = w.shape[1]
    cp_kwargs = dict(dimension_semantics=("parallel",))
    if vmem_limit is not None:
        cp_kwargs["vmem_limit_bytes"] = vmem_limit
    return pl.pallas_call(
        kernel,
        out_shape=jax.ShapeDtypeStruct((n_pad, f_out), out_dtype),
        grid=(n_pad // tm,),
        in_specs=[
            pl.BlockSpec((tm, n_pad), lambda i: (i, 0)),     # A_hat row slab
            pl.BlockSpec((n_pad, f_in), lambda i: (0, 0)),   # all prev-layer rows
            pl.BlockSpec((f_in, f_out), lambda i: (0, 0)),   # weights (BN folded)
            pl.BlockSpec((1, f_out), lambda i: (0, 0)),      # bias  (BN folded)
            pl.BlockSpec((tm, 1), lambda i: (i, 0)),         # D^-1/2 row slab
        ],
        out_specs=pl.BlockSpec((tm, f_out), lambda i: (i, 0)),
        compiler_params=pltpu.CompilerParams(**cp_kwargs),
    )(a_hat, g, w, b, d_row)


# ---------------------------------------------------------------------------
# Wrapper: one-time graph prep, BN folding, lane padding, per-layer calls
# ---------------------------------------------------------------------------
def prepare_graph(adj):
    """One-time, cacheable per-graph preprocessing.

    Returns (A + I) as exact 0/1 bf16 and D^-1/2 as f32, both zero-padded to a
    multiple of 128 rows/cols.  The kernels apply the D^-1/2 normalization, so
    the f32 normalized adjacency is never materialized or re-cast per call.
    """
    n = adj.shape[0]
    n_pad = _round_up(n, LANE)
    a_hat = adj + jnp.eye(n, dtype=adj.dtype)
    deg = jnp.sum(a_hat, axis=1)
    d_inv_sqrt = jnp.where(deg > 0, jax.lax.rsqrt(deg), 0.0)
    a_hat = _pad2(a_hat, n_pad, n_pad).astype(jnp.bfloat16)
    d_row = jnp.pad(d_inv_sqrt, (0, n_pad - n)).astype(jnp.float32).reshape(n_pad, 1)
    return a_hat, d_row


def _fold_bn(w, b, gamma, beta, mean, var):
    scale = gamma * jax.lax.rsqrt(var + BN_EPS)
    w_f = w * scale[None, :]
    b_f = (b - mean) * scale + beta
    return w_f, b_f


@functools.partial(jax.jit, static_argnames=("return_embeds",))
def gcn_forward(params, x, a_hat, d_row, return_embeds=False):
    """Eval-mode GCN forward.  a_hat/d_row come from prepare_graph (cache them)."""
    num_layers = len(params["convs"])
    n = x.shape[0]
    n_pad = a_hat.shape[0]
    num_classes = params["convs"][-1][0].shape[1]

    # Fold eval-mode BatchNorm into the hidden-layer conv weights / biases.
    ws, bs = [], []
    for layer in range(num_layers):
        w, b = params["convs"][layer]
        if layer < num_layers - 1:
            gamma, beta, mean, var = params["bns"][layer]
            w, b = _fold_bn(w, b, gamma, beta, mean, var)
        ws.append(w)
        bs.append(b)

    # Pad every feature dim to 128 lanes (free on the 128/256-wide MXU).
    f_pads = [_round_up(w.shape[0], LANE) for w in ws] + [_round_up(ws[-1].shape[1], LANE)]
    f_pad_max = max(f_pads)

    tm = _pick_row_tile(n_pad, f_pad_max)
    vmem_limit = _vmem_limit_bytes(tm, n_pad, f_pad_max)

    # Input activations, pre-scaled by D^-1/2 (cheap O(N*F) wrapper op).
    g = _pad2(x.astype(jnp.float32), n_pad, f_pads[0])
    g = (g * d_row).astype(jnp.bfloat16)

    out = None
    for layer in range(num_layers):
        f_in_p, f_out_p = f_pads[layer], f_pads[layer + 1]
        w_p = _pad2(ws[layer], f_in_p, f_out_p).astype(jnp.bfloat16)
        b_p = jnp.pad(bs[layer], (0, f_out_p - bs[layer].shape[0]))
        b_p = b_p.reshape(1, f_out_p).astype(jnp.float32)

        is_last = layer == num_layers - 1
        kernel = _make_layer_kernel(is_last, return_embeds, num_classes)
        out_dtype = jnp.float32 if is_last else jnp.bfloat16
        g = _layer_pallas_call(kernel, a_hat, g, w_p, b_p, d_row,
                               out_dtype, tm, vmem_limit)
        out = g

    return out[:n, :num_classes]


# ---------------------------------------------------------------------------
# Parameter construction + plain-JAX reference (for verification)
# ---------------------------------------------------------------------------
def init_gcn_params(key, input_dim, hidden_dim, output_dim, num_layers):
    """Deterministic init mirroring GCNConv.reset_parameters / BatchNorm1d."""
    dims = [input_dim] + [hidden_dim] * (num_layers - 1) + [output_dim]
    params = {"convs": [], "bns": []}
    for i in range(num_layers):
        f_in, f_out = dims[i], dims[i + 1]
        key, sub = jax.random.split(key)
        limit = jnp.sqrt(6.0 / (f_in + f_out))  # glorot uniform
        w = jax.random.uniform(sub, (f_in, f_out), jnp.float32, -limit, limit)
        b = jnp.zeros((f_out,), jnp.float32)
        params["convs"].append((w, b))
    for _ in range(num_layers - 1):
        params["bns"].append((
            jnp.ones((hidden_dim,), jnp.float32),    # gamma
            jnp.zeros((hidden_dim,), jnp.float32),   # beta
            jnp.zeros((hidden_dim,), jnp.float32),   # running_mean
            jnp.ones((hidden_dim,), jnp.float32),    # running_var
        ))
    return params


def gcn_normalize(adj):
    """A_norm = D^-1/2 (A + I) D^-1/2 (PyG GCNConv default normalization)."""
    n = adj.shape[0]
    a_hat = adj + jnp.eye(n, dtype=adj.dtype)
    deg = jnp.sum(a_hat, axis=1)
    d_inv_sqrt = jnp.where(deg > 0, jax.lax.rsqrt(deg), 0.0)
    return a_hat * d_inv_sqrt[:, None] * d_inv_sqrt[None, :]


def gcn_reference(params, x, adj, return_embeds=False):
    """Unfused f32 reference matching the PyTorch eval-mode forward."""
    adj_norm = gcn_normalize(adj)
    num_layers = len(params["convs"])
    h = x
    for layer in range(num_layers - 1):
        w, b = params["convs"][layer]
        gamma, beta, mean, var = params["bns"][layer]
        h = adj_norm @ (h @ w) + b
        h = (h - mean) * jax.lax.rsqrt(var + BN_EPS) * gamma + beta
        h = jnp.maximum(h, 0.0)
    w, b = params["convs"][-1]
    z = adj_norm @ (h @ w) + b
    if return_embeds:
        return z
    return jax.nn.log_softmax(z, axis=-1)


# ---------------------------------------------------------------------------
if __name__ == "__main__":
    N = 64            # number of nodes
    INPUT_DIM = 16    # node feature dim
    HIDDEN_DIM = 32
    OUTPUT_DIM = 8    # number of classes
    NUM_LAYERS = 3
    DROPOUT = 0.5     # unused in eval mode

    key = jax.random.PRNGKey(0)
    k_x, k_adj, k_params = jax.random.split(key, 3)

    x = jax.random.normal(k_x, (N, INPUT_DIM), jnp.float32)
    # random symmetric binary adjacency (no self loops; GCNConv adds them)
    a_rand = jax.random.uniform(k_adj, (N, N)) < 0.1
    adj = jnp.logical_or(a_rand, a_rand.T).astype(jnp.float32)
    adj = adj * (1.0 - jnp.eye(N, dtype=jnp.float32))

    params = init_gcn_params(k_params, INPUT_DIM, HIDDEN_DIM, OUTPUT_DIM,
                             NUM_LAYERS)

    # One-time per-graph preprocessing — cache and reuse across forward calls.
    a_hat, d_row = prepare_graph(adj)
    jax.block_until_ready((a_hat, d_row))

    out = gcn_forward(params, x, a_hat, d_row)
    jax.block_until_ready(out)

    assert out.shape == (N, OUTPUT_DIM)
    # rows of log-softmax output must exponentiate-sum to 1
    assert jnp.allclose(jnp.sum(jnp.exp(out), axis=-1), 1.0, atol=1e-4)
    # compare against unfused f32 reference (bf16 MXU operands)
    ref = gcn_reference(params, x, adj)
    assert jnp.allclose(out, ref, atol=1e-1), float(jnp.max(jnp.abs(out - ref)))
    print("KERNEL_OK")
</pallas_src>

<mosaic_0001>
module attributes {stable_mosaic.version = 11 : i64} {
  func.func @kernel(%arg0: i32, %arg1: memref<128x128xbf16, #tpu.memory_space<vmem>>, %arg2: memref<128x128xbf16, #tpu.memory_space<vmem>>, %arg3: memref<128x128xbf16, #tpu.memory_space<vmem>>, %arg4: memref<1x128xf32, #tpu.memory_space<vmem>>, %arg5: memref<128x1xf32, #tpu.memory_space<vmem>>, %arg6: memref<128x128xbf16, #tpu.memory_space<vmem>>) attributes {dimension_semantics = [#tpu.dimension_semantics<parallel>], iteration_bounds = array<i64: 1>, scalar_prefetch = 0 : i64, scratch_operands = 0 : i64, tpu.core_type = #tpu.core_type<tc>, window_params = [{transform_indices = @transform_0, window_bounds = array<i64: 128, 128>}, {pipeline_mode = #tpu.pipeline_mode<synchronous>, transform_indices = @transform_1, window_bounds = array<i64: 128, 128>}, {pipeline_mode = #tpu.pipeline_mode<synchronous>, transform_indices = @transform_2, window_bounds = array<i64: 128, 128>}, {pipeline_mode = #tpu.pipeline_mode<synchronous>, transform_indices = @transform_3, window_bounds = array<i64: 1, 128>}, {transform_indices = @transform_4, window_bounds = array<i64: 128, 1>}, {transform_indices = @transform_5, window_bounds = array<i64: 128, 128>}]} {
    %c0 = arith.constant 0 : index
    %c0_0 = arith.constant 0 : index
    %0 = vector.load %arg1[%c0, %c0_0] : memref<128x128xbf16, #tpu.memory_space<vmem>>, vector<128x128xbf16>
    %c0_1 = arith.constant 0 : index
    %c0_2 = arith.constant 0 : index
    %1 = vector.load %arg2[%c0_1, %c0_2] : memref<128x128xbf16, #tpu.memory_space<vmem>>, vector<128x128xbf16>
    %cst = arith.constant dense<0.000000e+00> : vector<128x128xf32>
    %2 = tpu.matmul %0, %1, %cst {dimension_numbers = #tpu.dot_dimension_numbers<[1], [0], [0], [1], [0, 0, 1, 1], [], []>} : vector<128x128xbf16>, vector<128x128xbf16>, vector<128x128xf32> -> vector<128x128xf32>
    %3 = arith.truncf %2 : vector<128x128xf32> to vector<128x128xbf16>
    %c0_3 = arith.constant 0 : index
    %c0_4 = arith.constant 0 : index
    %4 = vector.load %arg3[%c0_3, %c0_4] : memref<128x128xbf16, #tpu.memory_space<vmem>>, vector<128x128xbf16>
    %cst_5 = arith.constant dense<0.000000e+00> : vector<128x128xf32>
    %5 = tpu.matmul %3, %4, %cst_5 {dimension_numbers = #tpu.dot_dimension_numbers<[1], [0], [0], [1], [0, 0, 1, 1], [], []>} : vector<128x128xbf16>, vector<128x128xbf16>, vector<128x128xf32> -> vector<128x128xf32>
    %c0_6 = arith.constant 0 : index
    %c0_7 = arith.constant 0 : index
    %6 = vector.load %arg5[%c0_6, %c0_7] : memref<128x1xf32, #tpu.memory_space<vmem>>, vector<128x1xf32>
    %7 = vector.broadcast %6 : vector<128x1xf32> to vector<128x128xf32>
    %8 = arith.mulf %5, %7 : vector<128x128xf32>
    %c0_8 = arith.constant 0 : index
    %c0_9 = arith.constant 0 : index
    %9 = vector.load %arg4[%c0_8, %c0_9] : memref<1x128xf32, #tpu.memory_space<vmem>>, vector<1x128xf32>
    %10 = vector.broadcast %9 : vector<1x128xf32> to vector<128x128xf32>
    %11 = arith.addf %8, %10 : vector<128x128xf32>
    %cst_10 = arith.constant 0.000000e+00 : f32
    %12 = vector.broadcast %cst_10 : f32 to vector<128x128xf32>
    %13 = arith.maximumf %11, %12 : vector<128x128xf32>
    %c0_11 = arith.constant 0 : index
    %c0_12 = arith.constant 0 : index
    %14 = vector.load %arg5[%c0_11, %c0_12] : memref<128x1xf32, #tpu.memory_space<vmem>>, vector<128x1xf32>
    %15 = vector.broadcast %14 : vector<128x1xf32> to vector<128x128xf32>
    %16 = arith.mulf %13, %15 : vector<128x128xf32>
    %17 = arith.truncf %16 : vector<128x128xf32> to vector<128x128xbf16>
    %c0_13 = arith.constant 0 : index
    %c0_14 = arith.constant 0 : index
    %18 = vector.load %arg6[%c0_13, %c0_14] : memref<128x128xbf16, #tpu.memory_space<vmem>>, vector<128x128xbf16>
    tpu.vector_store %arg6[%c0_13, %c0_14], %17 {strides = array<i32>} : memref<128x128xbf16, #tpu.memory_space<vmem>>, vector<128x128xbf16>,
    return
  }
  func.func @transform_0(%arg0: i32) -> (i32, i32) {
    %c0_i32 = arith.constant 0 : i32
    %c0_i32_0 = arith.constant 0 : i32
    return %arg0, %c0_i32 : i32, i32
  }
  func.func @transform_1(%arg0: i32) -> (i32, i32) {
    %c0_i32 = arith.constant 0 : i32
    %c0_i32_0 = arith.constant 0 : i32
    %c0_i32_1 = arith.constant 0 : i32
    return %c0_i32, %c0_i32_0 : i32, i32
  }
  func.func @transform_2(%arg0: i32) -> (i32, i32) {
    %c0_i32 = arith.constant 0 : i32
    %c0_i32_0 = arith.constant 0 : i32
    %c0_i32_1 = arith.constant 0 : i32
    return %c0_i32, %c0_i32_0 : i32, i32
  }
  func.func @transform_3(%arg0: i32) -> (i32, i32) {
    %c0_i32 = arith.constant 0 : i32
    %c0_i32_0 = arith.constant 0 : i32
    %c0_i32_1 = arith.constant 0 : i32
    return %c0_i32, %c0_i32_0 : i32, i32
  }
  func.func @transform_4(%arg0: i32) -> (i32, i32) {
    %c0_i32 = arith.constant 0 : i32
    %c0_i32_0 = arith.constant 0 : i32
    return %arg0, %c0_i32 : i32, i32
  }
  func.func @transform_5(%arg0: i32) -> (i32, i32) {
    %c0_i32 = arith.constant 0 : i32
    %c0_i32_0 = arith.constant 0 : i32
    return %arg0, %c0_i32 : i32, i32
  }
}

module attributes {stable_mosaic.version = 11 : i64} {
  func.func @kernel(%arg0: i32, %arg1: memref<128x128xbf16, #tpu.memory_space<vmem>>, %arg2: memref<128x128xbf16, #tpu.memory_space<vmem>>, %arg3: memref<128x128xbf16, #tpu.memory_space<vmem>>, %arg4: memref<1x128xf32, #tpu.memory_space<vmem>>, %arg5: memref<128x1xf32, #tpu.memory_space<vmem>>, %arg6: memref<128x128xf32, #tpu.memory_space<vmem>>) attributes {dimension_semantics = [#tpu.dimension_semantics<parallel>], iteration_bounds = array<i64: 1>, scalar_prefetch = 0 : i64, scratch_operands = 0 : i64, tpu.core_type = #tpu.core_type<tc>, window_params = [{transform_indices = @transform_0, window_bounds = array<i64: 128, 128>}, {pipeline_mode = #tpu.pipeline_mode<synchronous>, transform_indices = @transform_1, window_bounds = array<i64: 128, 128>}, {pipeline_mode = #tpu.pipeline_mode<synchronous>, transform_indices = @transform_2, window_bounds = array<i64: 128, 128>}, {pipeline_mode = #tpu.pipeline_mode<synchronous>, transform_indices = @transform_3, window_bounds = array<i64: 1, 128>}, {transform_indices = @transform_4, window_bounds = array<i64: 128, 1>}, {transform_indices = @transform_5, window_bounds = array<i64: 128, 128>}]} {
    %c0 = arith.constant 0 : index
    %c0_0 = arith.constant 0 : index
    %0 = vector.load %arg1[%c0, %c0_0] : memref<128x128xbf16, #tpu.memory_space<vmem>>, vector<128x128xbf16>
    %c0_1 = arith.constant 0 : index
    %c0_2 = arith.constant 0 : index
    %1 = vector.load %arg2[%c0_1, %c0_2] : memref<128x128xbf16, #tpu.memory_space<vmem>>, vector<128x128xbf16>
    %cst = arith.constant dense<0.000000e+00> : vector<128x128xf32>
    %2 = tpu.matmul %0, %1, %cst {dimension_numbers = #tpu.dot_dimension_numbers<[1], [0], [0], [1], [0, 0, 1, 1], [], []>} : vector<128x128xbf16>, vector<128x128xbf16>, vector<128x128xf32> -> vector<128x128xf32>
    %3 = arith.truncf %2 : vector<128x128xf32> to vector<128x128xbf16>
    %c0_3 = arith.constant 0 : index
    %c0_4 = arith.constant 0 : index
    %4 = vector.load %arg3[%c0_3, %c0_4] : memref<128x128xbf16, #tpu.memory_space<vmem>>, vector<128x128xbf16>
    %cst_5 = arith.constant dense<0.000000e+00> : vector<128x128xf32>
    %5 = tpu.matmul %3, %4, %cst_5 {dimension_numbers = #tpu.dot_dimension_numbers<[1], [0], [0], [1], [0, 0, 1, 1], [], []>} : vector<128x128xbf16>, vector<128x128xbf16>, vector<128x128xf32> -> vector<128x128xf32>
    %c0_6 = arith.constant 0 : index
    %c0_7 = arith.constant 0 : index
    %6 = vector.load %arg5[%c0_6, %c0_7] : memref<128x1xf32, #tpu.memory_space<vmem>>, vector<128x1xf32>
    %7 = vector.broadcast %6 : vector<128x1xf32> to vector<128x128xf32>
    %8 = arith.mulf %5, %7 : vector<128x128xf32>
    %c0_8 = arith.constant 0 : index
    %c0_9 = arith.constant 0 : index
    %9 = vector.load %arg4[%c0_8, %c0_9] : memref<1x128xf32, #tpu.memory_space<vmem>>, vector<1x128xf32>
    %10 = vector.broadcast %9 : vector<1x128xf32> to vector<128x128xf32>
    %11 = arith.addf %8, %10 : vector<128x128xf32>
    %12 = tpu.iota {dimensions = array<i32: 1>} : vector<128x128xi32>
    %c8_i32 = arith.constant 8 : i32
    %13 = vector.broadcast %c8_i32 : i32 to vector<128x128xi32>
    %14 = arith.cmpi slt, %12, %13 : vector<128x128xi32>
    %cst_10 = arith.constant 0xFF800000 : f32
    %15 = vector.broadcast %cst_10 : f32 to vector<128x128xf32>
    %16 = arith.select %14, %11, %15 : vector<128x128xi1>, vector<128x128xf32>
    %cst_11 = arith.constant dense<0xFF800000> : vector<128xf32>
    %17 = vector.multi_reduction <maximumf>, %16, %cst_11 [1] : vector<128x128xf32> to vector<128xf32>
    %18 = vector.shape_cast %17 : vector<128xf32> to vector<128x1xf32>
    %19 = vector.broadcast %18 : vector<128x1xf32> to vector<128x128xf32>
    %20 = arith.subf %16, %19 : vector<128x128xf32>
    %21 = math.exp %20 : vector<128x128xf32>
    %cst_12 = arith.constant dense<0.000000e+00> : vector<128xf32>
    %22 = vector.multi_reduction <add>, %21, %cst_12 [1] : vector<128x128xf32> to vector<128xf32>
    %23 = vector.shape_cast %22 : vector<128xf32> to vector<128x1xf32>
    %24 = math.log %23 : vector<128x1xf32>
    %25 = vector.broadcast %24 : vector<128x1xf32> to vector<128x128xf32>
    %26 = arith.subf %20, %25 : vector<128x128xf32>
    %c0_13 = arith.constant 0 : index
    %c0_14 = arith.constant 0 : index
    %27 = vector.load %arg6[%c0_13, %c0_14] : memref<128x128xf32, #tpu.memory_space<vmem>>, vector<128x128xf32>
    tpu.vector_store %arg6[%c0_13, %c0_14], %26 {strides = array<i32>} : memref<128x128xf32, #tpu.memory_space<vmem>>, vector<128x128xf32>,
    return
  }
  func.func @transform_0(%arg0: i32) -> (i32, i32) {
    %c0_i32 = arith.constant 0 : i32
    %c0_i32_0 = arith.constant 0 : i32
    return %arg0, %c0_i32 : i32, i32
  }
  func.func @transform_1(%arg0: i32) -> (i32, i32) {
    %c0_i32 = arith.constant 0 : i32
    %c0_i32_0 = arith.constant 0 : i32
    %c0_i32_1 = arith.constant 0 : i32
    return %c0_i32, %c0_i32_0 : i32, i32
  }
  func.func @transform_2(%arg0: i32) -> (i32, i32) {
    %c0_i32 = arith.constant 0 : i32
    %c0_i32_0 = arith.constant 0 : i32
    %c0_i32_1 = arith.constant 0 : i32
    return %c0_i32, %c0_i32_0 : i32, i32
  }
  func.func @transform_3(%arg0: i32) -> (i32, i32) {
    %c0_i32 = arith.constant 0 : i32
    %c0_i32_0 = arith.constant 0 : i32
    %c0_i32_1 = arith.constant 0 : i32
    return %c0_i32, %c0_i32_0 : i32, i32
  }
  func.func @transform_4(%arg0: i32) -> (i32, i32) {
    %c0_i32 = arith.constant 0 : i32
    %c0_i32_0 = arith.constant 0 : i32
    return %arg0, %c0_i32 : i32, i32
  }
  func.func @transform_5(%arg0: i32) -> (i32, i32) {
    %c0_i32 = arith.constant 0 : i32
    %c0_i32_0 = arith.constant 0 : i32
    return %arg0, %c0_i32 : i32, i32
  }
}

</mosaic_0001>

<bundles_post_ra>
// kernel: gcn_forward.5
= control target key start
LH: loop header
LB: loop body
LE: loop exit
PB: predicated region body
PF: predicated region fallthrough
CT: control target
= control target key end

     0   :  { %v961_v24 = vmov 0   ;;  %s1344_s1 = inlined_call_operand.vmem [shape: bf16[128,128], index: 1, kind: input, shape index: {}]   ;;  %s1345_s0 = inlined_call_operand.vmem [shape: bf16[128,128], index: 0, kind: input, shape index: {}]   ;;  %s1346_s2 = inlined_call_operand.vmem [shape: bf16[128,128], index: 2, kind: input, shape index: {}]   ;;  %s1347_s4 = inlined_call_operand.vmem [shape: f32[128,1], index: 4, kind: input, shape index: {}]   ;;  %s1348_s3 = inlined_call_operand.vmem [shape: f32[1,128], index: 3, kind: input, shape index: {}]   ;;  %s1349_s5 = inlined_call_operand.vmem [shape: f32[128,128], index: 5, kind: output, shape index: {}]  }
   0x1   :  { %v873_v0 = vld [vmem:[%s1344_s1] sm:$0xff]   ;;  %v874_v1 = vld [vmem:[%s1344_s1 + $0x8] sm:$0xff]   ;;  %v875_v2 = vld [vmem:[%s1344_s1 + $0x10] sm:$0xff]   ;;  %872 = vset.pattern.permute.xlu1 %v961_v24  ;;  %871 = vset.pattern.permute.xlu0 %v961_v24 }
   0x2   :  { %806 = vmatprep.subr.bf16.mxu0 %v873_v0  ;;  %v876_v3 = vld [vmem:[%s1344_s1 + $0x18] sm:$0xff]   ;;  %v881_v4 = vld [vmem:[%s1345_s0] sm:$0xff]   ;;  %v878_v6 = vld [vmem:[%s1344_s1 + $0x28] sm:$0xff]  }
   0x3   :  { %807 = vmatpush3.bf16.msra.mxu0 %v873_v0  ;;  %822 = vmatprep.mubr.bf16.mxu0 %v881_v4  ;;  %v877_v5 = vld [vmem:[%s1344_s1 + $0x20] sm:$0xff]   ;;  %v890_v8 = vld [vmem:[%s1346_s2 + $0x8] sm:$0xff]   ;;  %v879_v9 = vld [vmem:[%s1344_s1 + $0x30] sm:$0xff]  }
   0x4   :  { %808 = vmatprep.subr.bf16.mxu0 %v874_v1  ;;  %v889_v7 = vld [vmem:[%s1346_s2] sm:$0xff]   ;;  %v891_v10 = vld [vmem:[%s1346_s2 + $0x10] sm:$0xff]   ;;  %v880_v11 = vld [vmem:[%s1344_s1 + $0x38] sm:$0xff]  }
   0x5   :  { %838 = vmatprep.subr.bf16.mxu1 %v889_v7  ;;  %v892_v12 = vld [vmem:[%s1346_s2 + $0x18] sm:$0xff]   ;;  %v893_v13 = vld [vmem:[%s1346_s2 + $0x20] sm:$0xff]   ;;  %v882_v14 = vld [vmem:[%s1345_s0 + $0x8] sm:$0xff]  }
   0x6   :  { %839 = vmatpush3.bf16.msra.mxu1 %v889_v7  ;;  %v883_v15 = vld [vmem:[%s1345_s0 + $0x10] sm:$0xff]   ;;  %v894_v16 = vld [vmem:[%s1346_s2 + $0x28] sm:$0xff]   ;;  %v884_v18 = vld [vmem:[%s1345_s0 + $0x18] sm:$0xff]  }
   0x7   :  { %809 = vmatpush3.bf16.msra.mxu0 %v874_v1  ;;  %840 = vmatprep.subr.bf16.mxu1 %v890_v8  ;;  %v895_v17 = vld [vmem:[%s1346_s2 + $0x30] sm:$0xff]   ;;  %v885_v19 = vld [vmem:[%s1345_s0 + $0x20] sm:$0xff]   ;;  %v886_v20 = vld [vmem:[%s1345_s0 + $0x28] sm:$0xff]  }
   0x8   :  { %810 = vmatprep.subr.bf16.mxu0 %v875_v2  ;;  %v887_v21 = vld [vmem:[%s1345_s0 + $0x30] sm:$0xff]   ;;  %v888_v22 = vld [vmem:[%s1345_s0 + $0x38] sm:$0xff]   ;;  %v415_v26 = vld [vmem:[%s1347_s4] sm:$0xff] }
   0x9   :  { %v896_v23 = vld [vmem:[%s1346_s2 + $0x38] sm:$0xff]   ;;  %v417_v25 = vld [vmem:[%s1347_s4 + $0x10] sm:$0xff]  ;;  %433 = vperm.xlu0 %871, %v415_v26   ;;  %v416_v28 = vld [vmem:[%s1347_s4 + $0x8] sm:$0xff] }
   0xa   :  { %841 = vmatpush3.bf16.msra.mxu1 %v890_v8  ;;  %443 = vperm.xlu1 %872, %v417_v25   ;;  %v418_v27 = vld [vmem:[%s1347_s4 + $0x18] sm:$0xff]  ;;  %v420_v29 = vld [vmem:[%s1347_s4 + $0x28] sm:$0xff]  ;;  %v419_v30 = vld [vmem:[%s1347_s4 + $0x20] sm:$0xff] }
   0xb   :  { %811 = vmatpush3.bf16.msra.mxu0 %v875_v2  ;;  %842 = vmatprep.subr.bf16.mxu1 %v891_v10  ;;  %v422_v31 = vld [vmem:[%s1347_s4 + $0x38] sm:$0xff]  ;;  %v421_v32 = vld [vmem:[%s1347_s4 + $0x30] sm:$0xff]  ;;  %v424_v33 = vld [vmem:[%s1347_s4 + $0x48] sm:$0xff] }
   0xc   :  { %812 = vmatprep.subr.bf16.mxu0 %v876_v3  ;;  %v423_v34 = vld [vmem:[%s1347_s4 + $0x40] sm:$0xff]  ;;  %v426_v35 = vld [vmem:[%s1347_s4 + $0x58] sm:$0xff]  ;;  %v425_v36 = vld [vmem:[%s1347_s4 + $0x50] sm:$0xff] }
   0xd   :  { %438 = vperm.xlu0 %871, %v416_v28   ;;  %v428_v37 = vld [vmem:[%s1347_s4 + $0x68] sm:$0xff]  ;;  %v427_v38 = vld [vmem:[%s1347_s4 + $0x60] sm:$0xff]  ;;  %v430_v39 = vld [vmem:[%s1347_s4 + $0x78] sm:$0xff] }
   0xe   :  { %843 = vmatpush3.bf16.msra.mxu1 %v891_v10  ;;  %448 = vperm.xlu1 %872, %v418_v27   ;;  %v429_v40 = vld [vmem:[%s1347_s4 + $0x70] sm:$0xff]  ;;  %v1117_v10 = vld [vmem:[%s1348_s3] ss:$0 sm:$0xff] }
   0xf   :  { %813 = vmatpush3.bf16.msra.mxu0 %v876_v3  ;;  %844 = vmatprep.subr.bf16.mxu1 %v892_v12 }
  0x10   :  { %814 = vmatprep.subr.bf16.mxu0 %v877_v5 }
  0x11   :  { %453 = vperm.xlu0 %871, %v419_v30  }
  0x12   :  { %845 = vmatpush3.bf16.msra.mxu1 %v892_v12  ;;  %458 = vperm.xlu1 %872, %v420_v29  }
  0x13   :  { %815 = vmatpush3.bf16.msra.mxu0 %v877_v5  ;;  %846 = vmatprep.subr.bf16.mxu1 %v893_v13  ;;  %v550_v5 = vlaneseq }
  0x14   :  { %816 = vmatprep.subr.bf16.mxu0 %v878_v6 }
  0x15   :  { %463 = vperm.xlu0 %871, %v421_v32   ;;  %v1112_v8 = vand.u32 127, %v550_v5 }
  0x16   :  { %847 = vmatpush3.bf16.msra.mxu1 %v893_v13  ;;  %468 = vperm.xlu1 %872, %v422_v31  }
  0x17   :  { %817 = vmatpush3.bf16.msra.mxu0 %v878_v6  ;;  %848 = vmatprep.subr.bf16.mxu1 %v894_v16  ;;  %vm552_vm0 = vcmp.lt.s32.totalorder %v1112_v8, 8 }
  0x18   :  { %818 = vmatprep.subr.bf16.mxu0 %v879_v9 }
  0x19   :  { %473 = vperm.xlu0 %871, %v423_v34  }
  0x1a   :  { %849 = vmatpush3.bf16.msra.mxu1 %v894_v16  ;;  %478 = vperm.xlu1 %872, %v424_v33  }
  0x1b   :  { %819 = vmatpush3.bf16.msra.mxu0 %v879_v9  ;;  %850 = vmatprep.subr.bf16.mxu1 %v895_v17 }
  0x1c   :  { %820 = vmatprep.subr.bf16.mxu0 %v880_v11 }
  0x1d   :  { %483 = vperm.xlu0 %871, %v425_v36  }
  0x1e   :  { %851 = vmatpush3.bf16.msra.mxu1 %v895_v17  ;;  %488 = vperm.xlu1 %872, %v426_v35  }
  0x1f   :  { %821 = vmatpush3.bf16.msra.mxu0 %v880_v11  ;;  %852 = vmatprep.subr.bf16.mxu1 %v896_v23 }
  0x21   :  { %493 = vperm.xlu0 %871, %v427_v38  }
  0x22   :  { %823 = vmatmul.mubr.bf16.vlgmr.msra.gmra.mrb[0].mxu0 %v882_v14  ;;  %853 = vmatpush3.bf16.msra.mxu1 %v896_v23 }
  0x23   :  { %826 = vmatprep.mubr.bf16.mxu0 %v883_v15  ;;  %498 = vperm.xlu1 %872, %v428_v37  }
  0x25   :  { %503 = vperm.xlu0 %871, %v429_v40  }
  0x27   :  { %508 = vperm.xlu1 %872, %v430_v39  }
  0x2a   :  { %827 = vmatmul.mubr.bf16.gmra.mrb[4].mxu0 %v884_v18 }
  0x2b   :  { %830 = vmatprep.mubr.bf16.mxu0 %v885_v19 }
  0x32   :  { %831 = vmatmul.mubr.bf16.gmra.mrb[8].mxu0 %v886_v20 }
  0x33   :  { %834 = vmatprep.mubr.bf16.mxu0 %v887_v21 }
  0x3a   :  { %835 = vmatmul.mubr.bf16.gmra.mrb[12].mxu0 %v888_v22 }
  0x88   :  { %v434_v1 = vpop.permute.xlu0 %433 }
  0x89   :  { %v444_v2 = vpop.permute.xlu1 %443 }
  0x8c   :  { %v439_v3 = vpop.permute.xlu0 %438 }
  0x8d   :  { %v449_v4 = vpop.permute.xlu1 %448 }
  0x90   :  { %v454_v6 = vpop.permute.xlu0 %453 }
  0x91   :  { %v459_v7 = vpop.permute.xlu1 %458 }
  0x94   :  { %v464_v11 = vpop.permute.xlu0 %463 }
  0x95   :  { %v469_v18 = vpop.permute.xlu1 %468 }
  0x98   :  { %v474_v24 = vpop.permute.xlu0 %473 }
  0x99   :  { %v479_v31 = vpop.permute.xlu1 %478 }
  0x9c   :  { %v484_v38 = vpop.permute.xlu0 %483 }
  0xf5   :  { %v824_v41 = vpop.f32.mrb[0].mxu0 }
  0xf6   :  { %v183_v42 = vpop.f32.mrb[1].mxu0 }
  0xf7   :  { %v825_v43 = vpop.f32.mrb[2].mxu0 }
  0xf8   :  { %v247_v44 = vpack.c.bf16 %v825_v43, %v824_v41  ;;  %v186_v45 = vpop.f32.mrb[3].mxu0  ;;  %v489_v43 = vpop.permute.xlu1 %488 }
  0xf9   :  { %v246_v46 = vpack.c.bf16 %v186_v45, %v183_v42 }
  0xfb   :  { %854 = vmatprep.mubr.bf16.mxu1 %v246_v46 }
  0xfc   :  { %855 = vmatmul.mubr.bf16.vlgmr.msra.gmra.mrb[0].mxu1 %v247_v44 }
  0xfd   :  { %v828_v47 = vpop.f32.mrb[4].mxu0 }
  0xfe   :  { %v199_v48 = vpop.f32.mrb[5].mxu0 }
  0xff   :  { %v829_v49 = vpop.f32.mrb[6].mxu0 }
 0x100   :  { %v249_v50 = vpack.c.bf16 %v829_v49, %v828_v47  ;;  %v202_v51 = vpop.f32.mrb[7].mxu0 }
 0x101   :  { %v248_v52 = vpack.c.bf16 %v202_v51, %v199_v48 }
 0x103   :  { %858 = vmatprep.mubr.bf16.mxu1 %v248_v52  ;;  %v494_v52 = vpop.permute.xlu0 %493 }
 0x104   :  { %859 = vmatmul.mubr.bf16.gmra.mrb[4].mxu1 %v249_v50 }
 0x105   :  { %v832_v53 = vpop.f32.mrb[8].mxu0 }
 0x106   :  { %v215_v54 = vpop.f32.mrb[9].mxu0 }
 0x107   :  { %v833_v55 = vpop.f32.mrb[10].mxu0 }
 0x108   :  { %v251_v56 = vpack.c.bf16 %v833_v55, %v832_v53  ;;  %v218_v57 = vpop.f32.mrb[11].mxu0 }
 0x109   :  { %v250_v58 = vpack.c.bf16 %v218_v57, %v215_v54 }
 0x10b   :  { %862 = vmatprep.mubr.bf16.mxu1 %v250_v58 }
 0x10c   :  { %863 = vmatmul.mubr.bf16.gmra.mrb[8].mxu1 %v251_v56 }
 0x10d   :  { %v836_v59 = vpop.f32.mrb[12].mxu0 }
 0x10e   :  { %v231_v60 = vpop.f32.mrb[13].mxu0 }
 0x10f   :  { %v837_v61 = vpop.f32.mrb[14].mxu0 }
 0x110   :  { %v253_v62 = vpack.c.bf16 %v837_v61, %v836_v59  ;;  %v234_v63 = vpop.f32.mrb[15].mxu0  ;;  %v499_v61 = vpop.permute.xlu1 %498 }
 0x111   :  { %v252_v0 = vpack.c.bf16 %v234_v63, %v231_v60  ;;  %v504_v63 = vpop.permute.xlu0 %503 }
 0x113   :  { %866 = vmatprep.mubr.bf16.mxu1 %v252_v0 }
 0x114   :  { %867 = vmatmul.mubr.bf16.gmra.mrb[12].mxu1 %v253_v62 }
 0x1cf   :  { %v856_v9 = vpop.f32.mrb[0].mxu1 }
 0x1d0   :  { %v513_v12 = vmul.f32 %v856_v9, %v444_v2  ;;  %v352_v13 = vpop.f32.mrb[1].mxu1  ;;  %v509_v9 = vpop.permute.xlu1 %508 }
 0x1d1   :  { %v511_v14 = vmul.f32 %v434_v1, %v352_v13  ;;  %v857_v15 = vpop.f32.mrb[2].mxu1 }
 0x1d2   :  { %v355_v16 = vpop.f32.mrb[3].mxu1  ;;  %v536_v17 = vadd.f32 %v1117_v10, %v513_v12  ;;  %v514_v20 = vmul.f32 %v857_v15, %v449_v4 }
 0x1d3   :  { %v512_v19 = vmul.f32 %v439_v3, %v355_v16  ;;  %v534_v22 = vadd.f32 %v1117_v10, %v511_v14 }
 0x1d4   :  { %v1123_v21 = vsel %vm552_vm0, %v536_v17, -inf  ;;  %v537_v30 = vadd.f32 %v1117_v10, %v514_v20 }
 0x1d5   :  { %573 = vmax.xlane.f32.xlu0 %v1123_v21  ;;  %v535_v23 = vadd.f32 %v1117_v10, %v512_v19  ;;  %v1135_v29 = vsel %vm552_vm0, %v534_v22, -inf }
 0x1d6   :  { %v1142_v39 = vsel %vm552_vm0, %v537_v30, -inf }
 0x1d7   :  { %v860_v25 = vpop.f32.mrb[4].mxu1  ;;  %v1130_v26 = vsel %vm552_vm0, %v535_v23, -inf }
 0x1d8   :  { %v517_v27 = vmul.f32 %v860_v25, %v464_v11  ;;  %571 = vmax.xlane.f32.xlu1 %v1130_v26  ;;  %v368_v28 = vpop.f32.mrb[5].mxu1 }
 0x1d9   :  { %v515_v32 = vmul.f32 %v454_v6, %v368_v28  ;;  %569 = vmax.xlane.f32.xlu0 %v1135_v29  ;;  %v861_v33 = vpop.f32.mrb[6].mxu1 }
 0x1da   :  { %v518_v34 = vmul.f32 %v861_v33, %v469_v18  ;;  %v371_v35 = vpop.f32.mrb[7].mxu1  ;;  %v540_v36 = vadd.f32 %v1117_v10, %v517_v27 }
 0x1db   :  { %v516_v37 = vmul.f32 %v459_v7, %v371_v35  ;;  %v538_v41 = vadd.f32 %v1117_v10, %v515_v32 }
 0x1dc   :  { %v1146_v40 = vsel %vm552_vm0, %v540_v36, -inf  ;;  %v541_v42 = vadd.f32 %v1117_v10, %v518_v34 }
 0x1dd   :  { %575 = vmax.xlane.f32.xlu0 %v1142_v39  ;;  %581 = vmax.xlane.f32.xlu1 %v1146_v40  ;;  %v539_v45 = vadd.f32 %v1117_v10, %v516_v37  ;;  %v1155_v48 = vsel %vm552_vm0, %v538_v41, -inf }
 0x1de   :  { %v1159_v49 = vsel %vm552_vm0, %v541_v42, -inf }
 0x1df   :  { %v864_v44 = vpop.f32.mrb[8].mxu1  ;;  %v1166_v56 = vsel %vm552_vm0, %v539_v45, -inf }
 0x1e0   :  { %v521_v46 = vmul.f32 %v864_v44, %v484_v38  ;;  %v384_v47 = vpop.f32.mrb[9].mxu1 }
 0x1e1   :  { %v519_v50 = vmul.f32 %v474_v24, %v384_v47  ;;  %577 = vmax.xlane.f32.xlu1 %v1155_v48  ;;  %583 = vmax.xlane.f32.xlu0 %v1159_v49  ;;  %v865_v51 = vpop.f32.mrb[10].mxu1 }
 0x1e2   :  { %v522_v53 = vmul.f32 %v865_v51, %v489_v43  ;;  %v387_v54 = vpop.f32.mrb[11].mxu1  ;;  %v544_v55 = vadd.f32 %v1117_v10, %v521_v46 }
 0x1e3   :  { %v520_v57 = vmul.f32 %v479_v31, %v387_v54  ;;  %v542_v59 = vadd.f32 %v1117_v10, %v519_v50 }
 0x1e4   :  { %v1170_v58 = vsel %vm552_vm0, %v544_v55, -inf  ;;  %v545_v60 = vadd.f32 %v1117_v10, %v522_v53 }
 0x1e5   :  { %579 = vmax.xlane.f32.xlu0 %v1166_v56  ;;  %589 = vmax.xlane.f32.xlu1 %v1170_v58  ;;  %v1178_v1 = vsel %vm552_vm0, %v542_v59, -inf  ;;  %v543_v3 = vadd.f32 %v1117_v10, %v520_v57 }
 0x1e6   :  { %v1182_v2 = vsel %vm552_vm0, %v545_v60, -inf }
 0x1e7   :  { %v868_v62 = vpop.f32.mrb[12].mxu1  ;;  %v1190_v14 = vsel %vm552_vm0, %v543_v3, -inf }
 0x1e8   :  { %v400_v0 = vpop.f32.mrb[13].mxu1  ;;  %v525_v4 = vmul.f32 %v868_v62, %v504_v63 }
 0x1e9   :  { %v523_v5 = vmul.f32 %v494_v52, %v400_v0  ;;  %585 = vmax.xlane.f32.xlu1 %v1178_v1  ;;  %591 = vmax.xlane.f32.xlu0 %v1182_v2  ;;  %v869_v6 = vpop.f32.mrb[14].mxu1 }
 0x1ea   :  { %v403_v7 = vpop.f32.mrb[15].mxu1  ;;  %v526_v13 = vmul.f32 %v869_v6, %v509_v9  ;;  %v548_v17 = vadd.f32 %v1117_v10, %v525_v4 }
 0x1eb   :  { %v524_v11 = vmul.f32 %v499_v61, %v403_v7  ;;  %v546_v12 = vadd.f32 %v1117_v10, %v523_v5 }
 0x1ec   :  { %v549_v19 = vadd.f32 %v1117_v10, %v526_v13  ;;  %v1208_v20 = vsel %vm552_vm0, %v548_v17, -inf }
 0x1ed   :  { %587 = vmax.xlane.f32.xlu0 %v1190_v14  ;;  %v1195_v15 = vsel %vm552_vm0, %v546_v12, -inf  ;;  %v547_v16 = vadd.f32 %v1117_v10, %v524_v11 }
 0x1ee   :  { %593 = vmax.xlane.f32.xlu1 %v1195_v15  ;;  %v1213_v22 = vsel %vm552_vm0, %v549_v19, -inf }
 0x1ef   :  { %v1202_v18 = vsel %vm552_vm0, %v547_v16, -inf }
 0x1f1   :  { %595 = vmax.xlane.f32.xlu0 %v1202_v18 }
 0x1f2   :  { %597 = vmax.xlane.f32.xlu1 %v1208_v20 }
 0x1f5   :  { %599 = vmax.xlane.f32.xlu0 %v1213_v22 }
 0x262   :  { %v574_v23 = vpop.xlane.xlu0 %573 }
 0x263   :  { %v1217_v24 = vsub.f32 %v1123_v21, %v574_v23 }
 0x265   :  { %v621_v10 = vmul.f32 1.442695, %v1217_v24  ;;  %v572_v25 = vpop.xlane.xlu1 %571 }
 0x266   :  { %v570_v27 = vpop.xlane.xlu0 %569  ;;  %v1225_v8 = vsub.f32 %v1130_v26, %v572_v25 }
 0x267   :  { %897 = vpow2.f32 %v621_v10  ;;  %v1221_v28 = vsub.f32 %v1135_v29, %v570_v27 }
 0x268   :  { %v619_v29 = vmul.f32 1.442695, %v1225_v8 }
 0x269   :  { %v617_v30 = vmul.f32 1.442695, %v1221_v28 }
 0x26a   :  { %v576_v31 = vpop.xlane.xlu0 %575  ;;  %v582_v32 = vpop.xlane.xlu1 %581 }
 0x26b   :  { %899 = vpow2.f32 %v617_v30  ;;  %v1228_v33 = vsub.f32 %v1142_v39, %v576_v31  ;;  %v1231_v21 = vsub.f32 %v1146_v40, %v582_v32 }
 0x26d   :  { %v623_v34 = vmul.f32 1.442695, %v1228_v33  ;;  %v629_v35 = vmul.f32 1.442695, %v1231_v21 }
 0x26e   :  { %v578_v36 = vpop.xlane.xlu1 %577  ;;  %v584_v37 = vpop.xlane.xlu0 %583 }
 0x26f   :  { %901 = vpow2.f32 %v623_v34  ;;  %v1237_v26 = vsub.f32 %v1155_v48, %v578_v36  ;;  %v1240_v38 = vsub.f32 %v1159_v49, %v584_v37 }
 0x270   :  { %903 = vpow2.f32 %v629_v35 }
 0x271   :  { %v898_v39 = vpop.eup %897  ;;  %v625_v40 = vmul.f32 1.442695, %v1237_v26  ;;  %905 = vpow2.f32 %v619_v29  ;;  %v631_v43 = vmul.f32 1.442695, %v1240_v38 }
 0x272   :  { %v580_v41 = vpop.xlane.xlu0 %579  ;;  %v590_v42 = vpop.xlane.xlu1 %589  ;;  %653 = vadd.xlane.f32.xlu1 %v898_v39 }
 0x273   :  { %907 = vpow2.f32 %v625_v40  ;;  %v1245_v44 = vsub.f32 %v1166_v56, %v580_v41  ;;  %v1248_v45 = vsub.f32 %v1170_v58, %v590_v42 }
 0x274   :  { %909 = vpow2.f32 %v631_v43 }
 0x275   :  { %v900_v46 = vpop.eup %899  ;;  %v637_v47 = vmul.f32 1.442695, %v1248_v45  ;;  %v627_v48 = vmul.f32 1.442695, %v1245_v44 }
 0x276   :  { %v586_v49 = vpop.xlane.xlu1 %585  ;;  %v592_v50 = vpop.xlane.xlu0 %591  ;;  %649 = vadd.xlane.f32.xlu1 %v900_v46 }
 0x277   :  { %v1253_v51 = vsub.f32 %v1178_v1, %v586_v49  ;;  %v1256_v52 = vsub.f32 %v1182_v2, %v592_v50  ;;  %911 = vpow2.f32 %v637_v47 }
 0x278   :  { %913 = vpow2.f32 %v627_v48 }
 0x279   :  { %v902_v53 = vpop.eup %901  ;;  %v633_v54 = vmul.f32 1.442695, %v1253_v51  ;;  %v639_v57 = vmul.f32 1.442695, %v1256_v52 }
 0x27a   :  { %v904_v55 = vpop.eup %903  ;;  %v588_v56 = vpop.xlane.xlu0 %587  ;;  %655 = vadd.xlane.f32.xlu0 %v902_v53 }
 0x27b   :  { %915 = vpow2.f32 %v633_v54  ;;  %v1261_v58 = vsub.f32 %v1190_v14, %v588_v56  ;;  %661 = vadd.xlane.f32.xlu1 %v904_v55  ;;  %v594_v59 = vpop.xlane.xlu1 %593  ;;  %v906_v60 = vpop.eup %905 }
 0x27c   :  { %v1264_v61 = vsub.f32 %v1195_v15, %v594_v59  ;;  %917 = vpow2.f32 %v639_v57 }
 0x27d   :  { %v908_v62 = vpop.eup %907  ;;  %v635_v1 = vmul.f32 1.442695, %v1261_v58 }
 0x27e   :  { %v641_v63 = vmul.f32 1.442695, %v1264_v61  ;;  %651 = vadd.xlane.f32.xlu0 %v906_v60  ;;  %v596_v0 = vpop.xlane.xlu0 %595  ;;  %v910_v5 = vpop.eup %909 }
 0x27f   :  { %657 = vadd.xlane.f32.xlu1 %v908_v62  ;;  %v1269_v2 = vsub.f32 %v1202_v18, %v596_v0  ;;  %v598_v3 = vpop.xlane.xlu1 %597 }
 0x280   :  { %919 = vpow2.f32 %v641_v63  ;;  %v1272_v4 = vsub.f32 %v1208_v20, %v598_v3 }
 0x281   :  { %v912_v6 = vpop.eup %911  ;;  %921 = vpow2.f32 %v635_v1  ;;  %v643_v11 = vmul.f32 1.442695, %v1269_v2 }
 0x282   :  { %v645_v7 = vmul.f32 1.442695, %v1272_v4  ;;  %663 = vadd.xlane.f32.xlu0 %v910_v5  ;;  %v600_v9 = vpop.xlane.xlu0 %599  ;;  %v914_v13 = vpop.eup %913 }
 0x283   :  { %669 = vadd.xlane.f32.xlu1 %v912_v6  ;;  %v1277_v12 = vsub.f32 %v1213_v22, %v600_v9 }
 0x284   :  { %923 = vpow2.f32 %v645_v7 }
 0x285   :  { %v916_v14 = vpop.eup %915  ;;  %925 = vpow2.f32 %v643_v11  ;;  %v647_v15 = vmul.f32 1.442695, %v1277_v12 }
 0x286   :  { %659 = vadd.xlane.f32.xlu0 %v914_v13  ;;  %v918_v16 = vpop.eup %917 }
 0x287   :  { %665 = vadd.xlane.f32.xlu1 %v916_v14  ;;  %927 = vpow2.f32 %v647_v15 }
 0x28a   :  { %v920_v17 = vpop.eup %919  ;;  %671 = vadd.xlane.f32.xlu0 %v918_v16 }
 0x28b   :  { %673 = vadd.xlane.f32.xlu1 %v920_v17  ;;  %v922_v18 = vpop.eup %921 }
 0x28e   :  { %v924_v19 = vpop.eup %923  ;;  %667 = vadd.xlane.f32.xlu0 %v922_v18 }
 0x28f   :  { %677 = vadd.xlane.f32.xlu1 %v924_v19  ;;  %v926_v20 = vpop.eup %925 }
 0x291   :  { %v928_v22 = vpop.eup %927 }
 0x292   :  { %675 = vadd.xlane.f32.xlu0 %v926_v20 }
 0x296   :  { %679 = vadd.xlane.f32.xlu0 %v928_v22 }
 0x2ff   :  { %v654_v23 = vpop.xlane.xlu1 %653 }
 0x300   :  { %929 = vlog2.f32 %v654_v23 }
 0x303   :  { %v650_v10 = vpop.xlane.xlu1 %649 }
 0x304   :  { %931 = vlog2.f32 %v650_v10 }
 0x307   :  { %v656_v25 = vpop.xlane.xlu0 %655 }
 0x308   :  { %v662_v27 = vpop.xlane.xlu1 %661  ;;  %933 = vlog2.f32 %v656_v25 }
 0x309   :  { %935 = vlog2.f32 %v662_v27 }
 0x30a   :  { %v930_v30 = vpop.eup %929 }
 0x30b   :  { %v686_v31 = vmul.f32 0.6931472, %v930_v30  ;;  %v652_v32 = vpop.xlane.xlu0 %651 }
 0x30c   :  { %v658_v34 = vpop.xlane.xlu1 %657  ;;  %937 = vlog2.f32 %v652_v32 }
 0x30d   :  { %v715_v35 = vsub.f32 %v1217_v24, %v686_v31  ;;  %939 = vlog2.f32 %v658_v34 }
 0x30e   :  { %v932_v29 = vpop.eup %931 }
 0x30f   :  { %731 = vst [vmem:[%s1349_s5 + $0x10] sm:$0xff] %v715_v35  ;;  %v682_v36 = vmul.f32 0.6931472, %v932_v29  ;;  %v664_v37 = vpop.xlane.xlu0 %663 }
 0x310   :  { %v670_v39 = vpop.xlane.xlu1 %669  ;;  %941 = vlog2.f32 %v664_v37 }
 0x311   :  { %v713_v40 = vsub.f32 %v1221_v28, %v682_v36  ;;  %943 = vlog2.f32 %v670_v39 }
 0x312   :  { %v934_v41 = vpop.eup %933 }
 0x313   :  { %v936_v42 = vpop.eup %935  ;;  %729 = vst [vmem:[%s1349_s5] sm:$0xff] %v713_v40  ;;  %v688_v24 = vmul.f32 0.6931472, %v934_v41  ;;  %v660_v43 = vpop.xlane.xlu0 %659 }
 0x314   :  { %v694_v46 = vmul.f32 0.6931472, %v936_v42  ;;  %v666_v47 = vpop.xlane.xlu1 %665  ;;  %945 = vlog2.f32 %v660_v43 }
 0x315   :  { %v716_v48 = vsub.f32 %v1228_v33, %v688_v24  ;;  %947 = vlog2.f32 %v666_v47 }
 0x316   :  { %v938_v49 = vpop.eup %937  ;;  %v719_v50 = vsub.f32 %v1231_v21, %v694_v46 }
 0x317   :  { %v940_v53 = vpop.eup %939  ;;  %732 = vst [vmem:[%s1349_s5 + $0x18] sm:$0xff] %v716_v48  ;;  %v684_v28 = vmul.f32 0.6931472, %v938_v49  ;;  %v672_v54 = vpop.xlane.xlu0 %671 }
 0x318   :  { %735 = vst [vmem:[%s1349_s5 + $0x30] sm:$0xff] %v719_v50  ;;  %v690_v55 = vmul.f32 0.6931472, %v940_v53  ;;  %949 = vlog2.f32 %v672_v54  ;;  %v674_v56 = vpop.xlane.xlu1 %673 }
 0x319   :  { %v714_v33 = vsub.f32 %v1225_v8, %v684_v28  ;;  %951 = vlog2.f32 %v674_v56 }
 0x31a   :  { %v942_v57 = vpop.eup %941  ;;  %v717_v21 = vsub.f32 %v1237_v26, %v690_v55 }
 0x31b   :  { %v944_v59 = vpop.eup %943  ;;  %730 = vst [vmem:[%s1349_s5 + $0x8] sm:$0xff] %v714_v33  ;;  %v696_v60 = vmul.f32 0.6931472, %v942_v57  ;;  %v668_v62 = vpop.xlane.xlu0 %667 }
 0x31c   :  { %733 = vst [vmem:[%s1349_s5 + $0x20] sm:$0xff] %v717_v21  ;;  %v702_v63 = vmul.f32 0.6931472, %v944_v59  ;;  %953 = vlog2.f32 %v668_v62  ;;  %v678_v0 = vpop.xlane.xlu1 %677 }
 0x31d   :  { %v720_v8 = vsub.f32 %v1240_v38, %v696_v60  ;;  %955 = vlog2.f32 %v678_v0 }
 0x31e   :  { %v946_v1 = vpop.eup %945  ;;  %v723_v26 = vsub.f32 %v1248_v45, %v702_v63 }
 0x31f   :  { %v948_v3 = vpop.eup %947  ;;  %736 = vst [vmem:[%s1349_s5 + $0x38] sm:$0xff] %v720_v8  ;;  %v692_v5 = vmul.f32 0.6931472, %v946_v1  ;;  %v676_v6 = vpop.xlane.xlu0 %675 }
 0x320   :  { %739 = vst [vmem:[%s1349_s5 + $0x50] sm:$0xff] %v723_v26  ;;  %v698_v7 = vmul.f32 0.6931472, %v948_v3  ;;  %957 = vlog2.f32 %v676_v6 }
 0x321   :  { %v718_v9 = vsub.f32 %v1245_v44, %v692_v5 }
 0x322   :  { %v950_v38 = vpop.eup %949  ;;  %v721_v11 = vsub.f32 %v1253_v51, %v698_v7 }
 0x323   :  { %v952_v13 = vpop.eup %951  ;;  %734 = vst [vmem:[%s1349_s5 + $0x28] sm:$0xff] %v718_v9  ;;  %v704_v45 = vmul.f32 0.6931472, %v950_v38  ;;  %v680_v14 = vpop.xlane.xlu0 %679 }
 0x324   :  { %737 = vst [vmem:[%s1349_s5 + $0x40] sm:$0xff] %v721_v11  ;;  %v706_v15 = vmul.f32 0.6931472, %v952_v13  ;;  %959 = vlog2.f32 %v680_v14 }
 0x325   :  { %v724_v16 = vsub.f32 %v1256_v52, %v704_v45 }
 0x326   :  { %v954_v17 = vpop.eup %953  ;;  %v725_v44 = vsub.f32 %v1264_v61, %v706_v15 }
 0x327   :  { %v956_v18 = vpop.eup %955  ;;  %740 = vst [vmem:[%s1349_s5 + $0x58] sm:$0xff] %v724_v16  ;;  %v700_v51 = vmul.f32 0.6931472, %v954_v17 }
 0x328   :  { %741 = vst [vmem:[%s1349_s5 + $0x60] sm:$0xff] %v725_v44  ;;  %v710_v19 = vmul.f32 0.6931472, %v956_v18 }
 0x329   :  { %v722_v20 = vsub.f32 %v1261_v58, %v700_v51 }
 0x32a   :  { %v958_v22 = vpop.eup %957  ;;  %v727_v23 = vsub.f32 %v1272_v4, %v710_v19 }
 0x32b   :  { %738 = vst [vmem:[%s1349_s5 + $0x48] sm:$0xff] %v722_v20  ;;  %v708_v52 = vmul.f32 0.6931472, %v958_v22 }
 0x32c   :  { %743 = vst [vmem:[%s1349_s5 + $0x70] sm:$0xff] %v727_v23 }
 0x32d   :  { %v726_v61 = vsub.f32 %v1269_v2, %v708_v52 }
 0x32e   :  { %v960_v10 = vpop.eup %959 }
 0x32f   :  { %742 = vst [vmem:[%s1349_s5 + $0x68] sm:$0xff] %v726_v61  ;;  %v712_v58 = vmul.f32 0.6931472, %v960_v10 }
 0x331   :  { %v728_v25 = vsub.f32 %v1277_v12, %v712_v58 }
 0x333   :  { %744 = vst [vmem:[%s1349_s5 + $0x78] sm:$0xff] %v728_v25 }

// kernel: gcn_forward.3
= control target key start
LH: loop header
LB: loop body
LE: loop exit
PB: predicated region body
PF: predicated region fallthrough
CT: control target
= control target key end

     0   :  { %v893_v24 = vmov 0   ;;  %s1097_s1 = inlined_call_operand.vmem [shape: bf16[128,128], index: 1, kind: input, shape index: {}]   ;;  %s1098_s0 = inlined_call_operand.vmem [shape: bf16[128,128], index: 0, kind: input, shape index: {}]   ;;  %s1099_s2 = inlined_call_operand.vmem [shape: bf16[128,128], index: 2, kind: input, shape index: {}]   ;;  %s1100_s4 = inlined_call_operand.vmem [shape: f32[128,1], index: 4, kind: input, shape index: {}]   ;;  %s1101_s3 = inlined_call_operand.vmem [shape: f32[1,128], index: 3, kind: input, shape index: {}]   ;;  %s1102_s5 = inlined_call_operand.vmem [shape: bf16[128,128], index: 5, kind: output, shape index: {}]  }
   0x1   :  { %v869_v0 = vld [vmem:[%s1097_s1] sm:$0xff]   ;;  %v870_v1 = vld [vmem:[%s1097_s1 + $0x8] sm:$0xff]   ;;  %v871_v2 = vld [vmem:[%s1097_s1 + $0x10] sm:$0xff]   ;;  %868 = vset.pattern.permute.xlu1 %v893_v24  ;;  %867 = vset.pattern.permute.xlu0 %v893_v24 }
   0x2   :  { %802 = vmatprep.subr.bf16.mxu0 %v869_v0  ;;  %v872_v3 = vld [vmem:[%s1097_s1 + $0x18] sm:$0xff]   ;;  %v877_v4 = vld [vmem:[%s1098_s0] sm:$0xff]   ;;  %v874_v6 = vld [vmem:[%s1097_s1 + $0x28] sm:$0xff]  }
   0x3   :  { %803 = vmatpush3.bf16.msra.mxu0 %v869_v0  ;;  %818 = vmatprep.mubr.bf16.mxu0 %v877_v4  ;;  %v873_v5 = vld [vmem:[%s1097_s1 + $0x20] sm:$0xff]   ;;  %v886_v8 = vld [vmem:[%s1099_s2 + $0x8] sm:$0xff]   ;;  %v875_v9 = vld [vmem:[%s1097_s1 + $0x30] sm:$0xff]  }
   0x4   :  { %804 = vmatprep.subr.bf16.mxu0 %v870_v1  ;;  %v885_v7 = vld [vmem:[%s1099_s2] sm:$0xff]   ;;  %v887_v10 = vld [vmem:[%s1099_s2 + $0x10] sm:$0xff]   ;;  %v876_v11 = vld [vmem:[%s1097_s1 + $0x38] sm:$0xff]  }
   0x5   :  { %834 = vmatprep.subr.bf16.mxu1 %v885_v7  ;;  %v888_v12 = vld [vmem:[%s1099_s2 + $0x18] sm:$0xff]   ;;  %v889_v13 = vld [vmem:[%s1099_s2 + $0x20] sm:$0xff]   ;;  %v878_v14 = vld [vmem:[%s1098_s0 + $0x8] sm:$0xff]  }
   0x6   :  { %835 = vmatpush3.bf16.msra.mxu1 %v885_v7  ;;  %v879_v15 = vld [vmem:[%s1098_s0 + $0x10] sm:$0xff]   ;;  %v890_v16 = vld [vmem:[%s1099_s2 + $0x28] sm:$0xff]   ;;  %v880_v18 = vld [vmem:[%s1098_s0 + $0x18] sm:$0xff]  }
   0x7   :  { %805 = vmatpush3.bf16.msra.mxu0 %v870_v1  ;;  %836 = vmatprep.subr.bf16.mxu1 %v886_v8  ;;  %v891_v17 = vld [vmem:[%s1099_s2 + $0x30] sm:$0xff]   ;;  %v881_v19 = vld [vmem:[%s1098_s0 + $0x20] sm:$0xff]   ;;  %v882_v20 = vld [vmem:[%s1098_s0 + $0x28] sm:$0xff]  }
   0x8   :  { %806 = vmatprep.subr.bf16.mxu0 %v871_v2  ;;  %v883_v21 = vld [vmem:[%s1098_s0 + $0x30] sm:$0xff]   ;;  %v884_v22 = vld [vmem:[%s1098_s0 + $0x38] sm:$0xff]   ;;  %v415_v26 = vld [vmem:[%s1100_s4] sm:$0xff] }
   0x9   :  { %v892_v23 = vld [vmem:[%s1099_s2 + $0x38] sm:$0xff]   ;;  %v417_v25 = vld [vmem:[%s1100_s4 + $0x10] sm:$0xff]  ;;  %433 = vperm.xlu0 %867, %v415_v26   ;;  %v416_v28 = vld [vmem:[%s1100_s4 + $0x8] sm:$0xff] }
   0xa   :  { %837 = vmatpush3.bf16.msra.mxu1 %v886_v8  ;;  %443 = vperm.xlu1 %868, %v417_v25   ;;  %v418_v27 = vld [vmem:[%s1100_s4 + $0x18] sm:$0xff]  ;;  %v420_v29 = vld [vmem:[%s1100_s4 + $0x28] sm:$0xff]  ;;  %v419_v30 = vld [vmem:[%s1100_s4 + $0x20] sm:$0xff] }
   0xb   :  { %807 = vmatpush3.bf16.msra.mxu0 %v871_v2  ;;  %838 = vmatprep.subr.bf16.mxu1 %v887_v10  ;;  %v422_v31 = vld [vmem:[%s1100_s4 + $0x38] sm:$0xff]  ;;  %v421_v32 = vld [vmem:[%s1100_s4 + $0x30] sm:$0xff]  ;;  %v424_v33 = vld [vmem:[%s1100_s4 + $0x48] sm:$0xff] }
   0xc   :  { %808 = vmatprep.subr.bf16.mxu0 %v872_v3  ;;  %v423_v34 = vld [vmem:[%s1100_s4 + $0x40] sm:$0xff]  ;;  %v426_v35 = vld [vmem:[%s1100_s4 + $0x58] sm:$0xff]  ;;  %v425_v36 = vld [vmem:[%s1100_s4 + $0x50] sm:$0xff] }
   0xd   :  { %438 = vperm.xlu0 %867, %v416_v28   ;;  %v428_v37 = vld [vmem:[%s1100_s4 + $0x68] sm:$0xff]  ;;  %v427_v38 = vld [vmem:[%s1100_s4 + $0x60] sm:$0xff]  ;;  %v430_v39 = vld [vmem:[%s1100_s4 + $0x78] sm:$0xff] }
   0xe   :  { %839 = vmatpush3.bf16.msra.mxu1 %v887_v10  ;;  %448 = vperm.xlu1 %868, %v418_v27   ;;  %v429_v40 = vld [vmem:[%s1100_s4 + $0x70] sm:$0xff] }
   0xf   :  { %809 = vmatpush3.bf16.msra.mxu0 %v872_v3  ;;  %840 = vmatprep.subr.bf16.mxu1 %v888_v12 }
  0x10   :  { %810 = vmatprep.subr.bf16.mxu0 %v873_v5 }
  0x11   :  { %453 = vperm.xlu0 %867, %v419_v30  }
  0x12   :  { %841 = vmatpush3.bf16.msra.mxu1 %v888_v12  ;;  %458 = vperm.xlu1 %868, %v420_v29  }
  0x13   :  { %811 = vmatpush3.bf16.msra.mxu0 %v873_v5  ;;  %842 = vmatprep.subr.bf16.mxu1 %v889_v13 }
  0x14   :  { %812 = vmatprep.subr.bf16.mxu0 %v874_v6 }
  0x15   :  { %463 = vperm.xlu0 %867, %v421_v32  }
  0x16   :  { %843 = vmatpush3.bf16.msra.mxu1 %v889_v13  ;;  %468 = vperm.xlu1 %868, %v422_v31  }
  0x17   :  { %813 = vmatpush3.bf16.msra.mxu0 %v874_v6  ;;  %844 = vmatprep.subr.bf16.mxu1 %v890_v16 }
  0x18   :  { %814 = vmatprep.subr.bf16.mxu0 %v875_v9 }
  0x19   :  { %473 = vperm.xlu0 %867, %v423_v34  }
  0x1a   :  { %845 = vmatpush3.bf16.msra.mxu1 %v890_v16  ;;  %478 = vperm.xlu1 %868, %v424_v33  }
  0x1b   :  { %815 = vmatpush3.bf16.msra.mxu0 %v875_v9  ;;  %846 = vmatprep.subr.bf16.mxu1 %v891_v17  ;;  %v1047_v9 = vld [vmem:[%s1101_s3] ss:$0 sm:$0xff] }
  0x1c   :  { %816 = vmatprep.subr.bf16.mxu0 %v876_v11 }
  0x1d   :  { %483 = vperm.xlu0 %867, %v425_v36  }
  0x1e   :  { %847 = vmatpush3.bf16.msra.mxu1 %v891_v17  ;;  %488 = vperm.xlu1 %868, %v426_v35  }
  0x1f   :  { %817 = vmatpush3.bf16.msra.mxu0 %v876_v11  ;;  %848 = vmatprep.subr.bf16.mxu1 %v892_v23 }
  0x21   :  { %493 = vperm.xlu0 %867, %v427_v38  }
  0x22   :  { %819 = vmatmul.mubr.bf16.vlgmr.msra.gmra.mrb[0].mxu0 %v878_v14  ;;  %849 = vmatpush3.bf16.msra.mxu1 %v892_v23 }
  0x23   :  { %822 = vmatprep.mubr.bf16.mxu0 %v879_v15  ;;  %498 = vperm.xlu1 %868, %v428_v37  }
  0x25   :  { %503 = vperm.xlu0 %867, %v429_v40  }
  0x27   :  { %508 = vperm.xlu1 %868, %v430_v39  }
  0x2a   :  { %823 = vmatmul.mubr.bf16.gmra.mrb[4].mxu0 %v880_v18 }
  0x2b   :  { %826 = vmatprep.mubr.bf16.mxu0 %v881_v19 }
  0x32   :  { %827 = vmatmul.mubr.bf16.gmra.mrb[8].mxu0 %v882_v20 }
  0x33   :  { %830 = vmatprep.mubr.bf16.mxu0 %v883_v21 }
  0x3a   :  { %831 = vmatmul.mubr.bf16.gmra.mrb[12].mxu0 %v884_v22 }
  0x88   :  { %v434_v1 = vpop.permute.xlu0 %433 }
  0x89   :  { %v444_v2 = vpop.permute.xlu1 %443 }
  0x8c   :  { %v439_v3 = vpop.permute.xlu0 %438 }
  0x8d   :  { %v449_v4 = vpop.permute.xlu1 %448 }
  0x90   :  { %v454_v5 = vpop.permute.xlu0 %453 }
  0x91   :  { %v459_v6 = vpop.permute.xlu1 %458 }
  0x94   :  { %v464_v7 = vpop.permute.xlu0 %463 }
  0x95   :  { %v469_v12 = vpop.permute.xlu1 %468 }
  0x98   :  { %v1052_v22 = vpop.permute.xlu0 %473 }
  0x99   :  { %v1055_v26 = vpop.permute.xlu1 %478 }
  0xf5   :  { %v820_v41 = vpop.f32.mrb[0].mxu0 }
  0xf6   :  { %v183_v42 = vpop.f32.mrb[1].mxu0 }
  0xf7   :  { %v821_v43 = vpop.f32.mrb[2].mxu0 }
  0xf8   :  { %v247_v44 = vpack.c.bf16 %v821_v43, %v820_v41  ;;  %v186_v45 = vpop.f32.mrb[3].mxu0  ;;  %v484_v41 = vpop.permute.xlu0 %483 }
  0xf9   :  { %v246_v46 = vpack.c.bf16 %v186_v45, %v183_v42 }
  0xfb   :  { %850 = vmatprep.mubr.bf16.mxu1 %v246_v46 }
  0xfc   :  { %851 = vmatmul.mubr.bf16.vlgmr.msra.gmra.mrb[0].mxu1 %v247_v44 }
  0xfd   :  { %v824_v47 = vpop.f32.mrb[4].mxu0 }
  0xfe   :  { %v199_v48 = vpop.f32.mrb[5].mxu0 }
  0xff   :  { %v825_v49 = vpop.f32.mrb[6].mxu0 }
 0x100   :  { %v249_v50 = vpack.c.bf16 %v825_v49, %v824_v47  ;;  %v202_v51 = vpop.f32.mrb[7].mxu0  ;;  %v489_v47 = vpop.permute.xlu1 %488 }
 0x101   :  { %v248_v52 = vpack.c.bf16 %v202_v51, %v199_v48 }
 0x103   :  { %854 = vmatprep.mubr.bf16.mxu1 %v248_v52 }
 0x104   :  { %855 = vmatmul.mubr.bf16.gmra.mrb[4].mxu1 %v249_v50 }
 0x105   :  { %v828_v53 = vpop.f32.mrb[8].mxu0 }
 0x106   :  { %v215_v54 = vpop.f32.mrb[9].mxu0 }
 0x107   :  { %v829_v55 = vpop.f32.mrb[10].mxu0 }
 0x108   :  { %v251_v56 = vpack.c.bf16 %v829_v55, %v828_v53  ;;  %v218_v57 = vpop.f32.mrb[11].mxu0 }
 0x109   :  { %v250_v58 = vpack.c.bf16 %v218_v57, %v215_v54  ;;  %v494_v57 = vpop.permute.xlu0 %493 }
 0x10b   :  { %858 = vmatprep.mubr.bf16.mxu1 %v250_v58 }
 0x10c   :  { %859 = vmatmul.mubr.bf16.gmra.mrb[8].mxu1 %v251_v56 }
 0x10d   :  { %v832_v59 = vpop.f32.mrb[12].mxu0 }
 0x10e   :  { %v231_v60 = vpop.f32.mrb[13].mxu0 }
 0x10f   :  { %v833_v61 = vpop.f32.mrb[14].mxu0 }
 0x110   :  { %v253_v62 = vpack.c.bf16 %v833_v61, %v832_v59  ;;  %v234_v63 = vpop.f32.mrb[15].mxu0 }
 0x111   :  { %v252_v0 = vpack.c.bf16 %v234_v63, %v231_v60 }
 0x113   :  { %862 = vmatprep.mubr.bf16.mxu1 %v252_v0 }
 0x114   :  { %863 = vmatmul.mubr.bf16.gmra.mrb[12].mxu1 %v253_v62 }
 0x1cf   :  { %v852_v8 = vpop.f32.mrb[0].mxu1 }
 0x1d0   :  { %v513_v10 = vmul.f32 %v852_v8, %v444_v2  ;;  %v352_v11 = vpop.f32.mrb[1].mxu1 }
 0x1d1   :  { %v511_v13 = vmul.f32 %v434_v1, %v352_v11  ;;  %v853_v14 = vpop.f32.mrb[2].mxu1 }
 0x1d2   :  { %v536_v15 = vadd.f32 %v1047_v9, %v513_v10  ;;  %v514_v16 = vmul.f32 %v853_v14, %v449_v4  ;;  %v355_v17 = vpop.f32.mrb[3].mxu1 }
 0x1d3   :  { %v534_v18 = vadd.f32 %v1047_v9, %v511_v13  ;;  %v512_v19 = vmul.f32 %v439_v3, %v355_v17 }
 0x1d4   :  { %v552_v20 = vmax.f32 %v536_v15, 0.0  ;;  %v537_v21 = vadd.f32 %v1047_v9, %v514_v16 }
 0x1d5   :  { %v550_v23 = vmax.f32 %v534_v18, 0.0  ;;  %v535_v24 = vadd.f32 %v1047_v9, %v512_v19 }
 0x1d6   :  { %v553_v25 = vmax.f32 %v537_v21, 0.0  ;;  %v568_v29 = vmul.f32 %v552_v20, %v444_v2  ;;  %v499_v2 = vpop.permute.xlu1 %498 }
 0x1d7   :  { %v551_v27 = vmax.f32 %v535_v24, 0.0  ;;  %v856_v28 = vpop.f32.mrb[4].mxu1  ;;  %v566_v33 = vmul.f32 %v550_v23, %v434_v1 }
 0x1d8   :  { %v569_v30 = vmul.f32 %v553_v25, %v449_v4  ;;  %v517_v31 = vmul.f32 %v856_v28, %v464_v7  ;;  %v368_v32 = vpop.f32.mrb[5].mxu1 }
 0x1d9   :  { %v567_v34 = vmul.f32 %v551_v27, %v439_v3  ;;  %v515_v35 = vmul.f32 %v454_v5, %v368_v32  ;;  %v857_v36 = vpop.f32.mrb[6].mxu1 }
 0x1da   :  { %v731_v37 = vpack.c.bf16 %v569_v30, %v568_v29  ;;  %v540_v38 = vadd.f32 %v1047_v9, %v517_v31  ;;  %v518_v39 = vmul.f32 %v857_v36, %v469_v12  ;;  %v371_v40 = vpop.f32.mrb[7].mxu1  ;;  %v509_v19 = vpop.permute.xlu1 %508 }
 0x1db   :  { %v726_v42 = vpack.c.bf16 %v567_v34, %v566_v33  ;;  %v538_v43 = vadd.f32 %v1047_v9, %v515_v35  ;;  %v516_v44 = vmul.f32 %v459_v6, %v371_v40 }
 0x1dc   :  { %763 = vst [vmem:[%s1102_s5 + $0x8] sm:$0xff] %v731_v37   ;;  %v556_v45 = vmax.f32 %v540_v38, 0.0  ;;  %v541_v46 = vadd.f32 %v1047_v9, %v518_v39 }
 0x1dd   :  { %727 = vst [vmem:[%s1102_s5] sm:$0xff] %v726_v42   ;;  %v554_v48 = vmax.f32 %v538_v43, 0.0  ;;  %v539_v49 = vadd.f32 %v1047_v9, %v516_v44 }
 0x1de   :  { %v557_v50 = vmax.f32 %v541_v46, 0.0  ;;  %v572_v53 = vmul.f32 %v556_v45, %v464_v7 }
 0x1df   :  { %v555_v51 = vmax.f32 %v539_v49, 0.0  ;;  %v860_v52 = vpop.f32.mrb[8].mxu1  ;;  %v570_v58 = vmul.f32 %v554_v48, %v454_v5 }
 0x1e0   :  { %v573_v54 = vmul.f32 %v557_v50, %v469_v12  ;;  %v521_v55 = vmul.f32 %v860_v52, %v484_v41  ;;  %v384_v56 = vpop.f32.mrb[9].mxu1  ;;  %v504_v12 = vpop.permute.xlu0 %503 }
 0x1e1   :  { %v571_v59 = vmul.f32 %v555_v51, %v459_v6  ;;  %v519_v60 = vmul.f32 %v1052_v22, %v384_v56  ;;  %v861_v61 = vpop.f32.mrb[10].mxu1 }
 0x1e2   :  { %v741_v62 = vpack.c.bf16 %v573_v54, %v572_v53  ;;  %v544_v63 = vadd.f32 %v1047_v9, %v521_v55  ;;  %v522_v0 = vmul.f32 %v861_v61, %v489_v47  ;;  %v387_v1 = vpop.f32.mrb[11].mxu1 }
 0x1e3   :  { %v736_v3 = vpack.c.bf16 %v571_v59, %v570_v58  ;;  %v542_v4 = vadd.f32 %v1047_v9, %v519_v60  ;;  %v520_v7 = vmul.f32 %v1055_v26, %v387_v1 }
 0x1e4   :  { %765 = vst [vmem:[%s1102_s5 + $0x18] sm:$0xff] %v741_v62   ;;  %v560_v5 = vmax.f32 %v544_v63, 0.0  ;;  %v545_v6 = vadd.f32 %v1047_v9, %v522_v0 }
 0x1e5   :  { %764 = vst [vmem:[%s1102_s5 + $0x10] sm:$0xff] %v736_v3   ;;  %v558_v8 = vmax.f32 %v542_v4, 0.0  ;;  %v543_v10 = vadd.f32 %v1047_v9, %v520_v7 }
 0x1e6   :  { %v561_v11 = vmax.f32 %v545_v6, 0.0  ;;  %v576_v15 = vmul.f32 %v560_v5, %v484_v41 }
 0x1e7   :  { %v559_v13 = vmax.f32 %v543_v10, 0.0  ;;  %v864_v14 = vpop.f32.mrb[12].mxu1  ;;  %v574_v20 = vmul.f32 %v558_v8, %v1052_v22 }
 0x1e8   :  { %v577_v16 = vmul.f32 %v561_v11, %v489_v47  ;;  %v525_v17 = vmul.f32 %v864_v14, %v504_v12  ;;  %v400_v18 = vpop.f32.mrb[13].mxu1 }
 0x1e9   :  { %v575_v21 = vmul.f32 %v559_v13, %v1055_v26  ;;  %v523_v23 = vmul.f32 %v494_v57, %v400_v18  ;;  %v865_v24 = vpop.f32.mrb[14].mxu1 }
 0x1ea   :  { %v751_v25 = vpack.c.bf16 %v577_v16, %v576_v15  ;;  %v548_v27 = vadd.f32 %v1047_v9, %v525_v17  ;;  %v526_v28 = vmul.f32 %v865_v24, %v509_v19  ;;  %v403_v29 = vpop.f32.mrb[15].mxu1 }
 0x1eb   :  { %v746_v30 = vpack.c.bf16 %v575_v21, %v574_v20  ;;  %v546_v31 = vadd.f32 %v1047_v9, %v523_v23  ;;  %v524_v32 = vmul.f32 %v499_v2, %v403_v29 }
 0x1ec   :  { %767 = vst [vmem:[%s1102_s5 + $0x28] sm:$0xff] %v751_v25   ;;  %v564_v33 = vmax.f32 %v548_v27, 0.0  ;;  %v549_v22 = vadd.f32 %v1047_v9, %v526_v28 }
 0x1ed   :  { %766 = vst [vmem:[%s1102_s5 + $0x20] sm:$0xff] %v746_v30   ;;  %v562_v26 = vmax.f32 %v546_v31, 0.0  ;;  %v547_v34 = vadd.f32 %v1047_v9, %v524_v32 }
 0x1ee   :  { %v565_v35 = vmax.f32 %v549_v22, 0.0  ;;  %v580_v37 = vmul.f32 %v564_v33, %v504_v12 }
 0x1ef   :  { %v563_v36 = vmax.f32 %v547_v34, 0.0  ;;  %v578_v39 = vmul.f32 %v562_v26, %v494_v57 }
 0x1f0   :  { %v581_v38 = vmul.f32 %v565_v35, %v509_v19 }
 0x1f1   :  { %v579_v40 = vmul.f32 %v563_v36, %v499_v2 }
 0x1f2   :  { %v761_v41 = vpack.c.bf16 %v581_v38, %v580_v37 }
 0x1f3   :  { %v756_v42 = vpack.c.bf16 %v579_v40, %v578_v39 }
 0x1f4   :  { %769 = vst [vmem:[%s1102_s5 + $0x38] sm:$0xff] %v761_v41  }
 0x1f5   :  { %768 = vst [vmem:[%s1102_s5 + $0x30] sm:$0xff] %v756_v42  }

</bundles_post_ra>
